<compile_context>
chip_gen: v6e
topology: v6e:2x2x1
jax: 0.10.0
libtpu: 0.0.40
codegen_flags: <defaults>
</compile_context>

<pallas_src>
import functools

import jax
import jax.numpy as jnp
from jax.experimental import pallas as pl
from jax.experimental.pallas import tpu as pltpu


_NT_DIMS = (((1,), (1,)), ((), ()))  # contract last dims of both operands: A @ B.T on the MXU


def _mlp_and_scale(x, w1, b1, w2, b2, *, lower, upper, use_bf16):
    """MLP features + ScaleToBounds (training-mode batch min/max). Pure array math."""
    if use_bf16:  # v6e/v7x: native bf16 MXU, f32 accumulation (off by default at toy sizes)
        x, w1, w2 = x.astype(jnp.bfloat16), w1.astype(jnp.bfloat16), w2.astype(jnp.bfloat16)
    h = jnp.dot(x, w1, preferred_element_type=jnp.float32) + b1
    h = jnp.maximum(h, 0.0)                                   # ReLU
    if use_bf16:
        h = h.astype(jnp.bfloat16)
    f = jnp.dot(h, w2, preferred_element_type=jnp.float32) + b2

    # gpytorch.utils.grid.ScaleToBounds, training-mode semantics (batch min/max).
    fmin = jnp.min(f)
    fmax = jnp.max(f)
    diff = jnp.maximum(fmax - fmin, 1e-12)                    # guard degenerate batch
    scale = (0.95 * (upper - lower)) / diff                   # one scalar divide per call
    return (f - fmin) * scale + 0.95 * lower


def _rbf(f_rows, f_cols, sq_rows, sq_cols, *, neg_half_inv_ls2, outputscale):
    """outputscale * exp(-0.5 * ||xi - xj||^2 / ls^2); gram on the MXU, f32 throughout."""
    gram = jax.lax.dot_general(f_rows, f_cols, _NT_DIMS,
                               preferred_element_type=jnp.float32)
    # NOTE: keep this expansion in f32 (cancellation-prone); clamp handles small negatives.
    d2 = jnp.maximum(sq_rows + sq_cols - 2.0 * gram, 0.0)
    return outputscale * jnp.exp(d2 * neg_half_inv_ls2)


# --------------- fully fused kernel (small / moderate N) ---------------
def dkl_fused_kernel(x_ref, w1_ref, b1_ref, w2_ref, b2_ref, covar_ref, *,
                     lower, upper, neg_half_inv_ls2, outputscale, use_bf16):
    f = _mlp_and_scale(x_ref[...], w1_ref[...], b1_ref[...], w2_ref[...], b2_ref[...],
                       lower=lower, upper=upper, use_bf16=use_bf16)
    sq = jnp.sum(f * f, axis=-1, keepdims=True)               # (N, 1)
    covar_ref[...] = _rbf(f, f, sq, sq.T,
                          neg_half_inv_ls2=neg_half_inv_ls2, outputscale=outputscale)


# --------------- tiled path, stage 1: features + row squared norms ---------------
def feature_kernel(x_ref, w1_ref, b1_ref, w2_ref, b2_ref, f_ref, sq_ref, *,
                   lower, upper, use_bf16):
    f = _mlp_and_scale(x_ref[...], w1_ref[...], b1_ref[...], w2_ref[...], b2_ref[...],
                       lower=lower, upper=upper, use_bf16=use_bf16)
    f_ref[...] = f
    sq_ref[...] = jnp.sum(f * f, axis=-1, keepdims=True)      # (N, 1)


# --------------- tiled path, stage 2: one lane-dense covariance tile ---------------
def rbf_tile_kernel(fr_ref, fc_ref, sqr_ref, sqc_ref, covar_ref, *,
                    neg_half_inv_ls2, outputscale):
    covar_ref[...] = _rbf(fr_ref[...], fc_ref[...], sqr_ref[...], sqc_ref[...],
                          neg_half_inv_ls2=neg_half_inv_ls2, outputscale=outputscale)


def _largest_divisor_tile(n, candidates):
    for c in candidates:
        if n % c == 0:
            return c
    return n


def dkl_forward(x, params, *, grid_bounds=(-1.0, 1.0), lengthscale=0.6931472,
                outputscale=0.6931472, mean_const=0.0, use_bf16_mlp=False,
                fuse_threshold=512):
    w1, b1, w2, b2 = params
    N = x.shape[0]
    F = w2.shape[1]
    lower, upper = float(grid_bounds[0]), float(grid_bounds[1])
    neg_half_inv_ls2 = -0.5 / (float(lengthscale) * float(lengthscale))
    outputscale = float(outputscale)

    # ConstantMean is data-independent: emit in the wrapper (no masked (N,1) kernel output).
    mean = jnp.full((N,), float(mean_const), dtype=jnp.float32)

    vmem = pl.BlockSpec(memory_space=pltpu.MemorySpace.VMEM)

    if N <= fuse_threshold:
        # Single fused kernel: one launch, features stay in VMEM, covar as one block.
        covar = pl.pallas_call(
            functools.partial(dkl_fused_kernel, lower=lower, upper=upper,
                              neg_half_inv_ls2=neg_half_inv_ls2,
                              outputscale=outputscale, use_bf16=use_bf16_mlp),
            out_shape=jax.ShapeDtypeStruct((N, N), jnp.float32),
            in_specs=[vmem] * 5,
            out_specs=vmem,
        )(x, w1, b1, w2, b2)
        return mean, covar

    # ---------------- tiled path (large N) ----------------
    # Stage 1: whole-batch features + ScaleToBounds + row squared norms (single launch;
    # min/max needs the full batch anyway).  F is tiny, so the non-lane-dense (N, F)
    # output is negligible next to the (N, N) covariance.
    feats, sq_rows = pl.pallas_call(
        functools.partial(feature_kernel, lower=lower, upper=upper, use_bf16=use_bf16_mlp),
        out_shape=(jax.ShapeDtypeStruct((N, F), jnp.float32),
                   jax.ShapeDtypeStruct((N, 1), jnp.float32)),
        in_specs=[vmem] * 5,
        out_specs=(vmem, vmem),
    )(x, w1, b1, w2, b2)

    # Pad to a multiple of 128 AFTER ScaleToBounds so batch min/max semantics are intact.
    Np = ((N + 127) // 128) * 128
    if Np != N:
        feats = jnp.pad(feats, ((0, Np - N), (0, 0)))
        sq_rows = jnp.pad(sq_rows, ((0, Np - N), (0, 0)))
    sq_cols = sq_rows.reshape(1, Np)  # lane-dense column-norm vector (layout only, done once)

    tm = _largest_divisor_tile(Np, (256, 128))
    tn = _largest_divisor_tile(Np, (512, 256, 128))

    covar = pl.pallas_call(
        functools.partial(rbf_tile_kernel, neg_half_inv_ls2=neg_half_inv_ls2,
                          outputscale=outputscale),
        out_shape=jax.ShapeDtypeStruct((Np, Np), jnp.float32),
        grid_spec=pltpu.PrefetchScalarGridSpec(
            num_scalar_prefetch=0,
            grid=(Np // tm, Np // tn),
            in_specs=[pl.BlockSpec((tm, F), lambda i, j: (i, 0)),   # row feature block
                      pl.BlockSpec((tn, F), lambda i, j: (j, 0)),   # col feature block
                      pl.BlockSpec((tm, 1), lambda i, j: (i, 0)),   # row squared norms
                      pl.BlockSpec((1, tn), lambda i, j: (0, j))],  # col squared norms
            out_specs=pl.BlockSpec((tm, tn), lambda i, j: (i, j)),
        ),
        compiler_params=pltpu.CompilerParams(
            dimension_semantics=("parallel", "parallel"),   # v7x: shard tiles over both TCs
            vmem_limit_bytes=32 * 1024 * 1024),             # explicit: fits v7x 64 MiB / v5e
    )(feats, feats, sq_rows, sq_cols)

    if Np != N:
        covar = covar[:N, :N]
    return mean, covar


# ---------------------------------- Demo / check ----------------------------------
def _reference(x, params, *, grid_bounds, lengthscale, outputscale, mean_const):
    w1, b1, w2, b2 = params
    hi = jax.lax.Precision.HIGHEST
    h = jnp.maximum(jnp.dot(x, w1, precision=hi) + b1, 0.0)
    f = jnp.dot(h, w2, precision=hi) + b2
    fmin, fmax = jnp.min(f), jnp.max(f)
    diff = jnp.maximum(fmax - fmin, 1e-12)
    f = (f - fmin) * (0.95 * (grid_bounds[1] - grid_bounds[0]) / diff) + 0.95 * grid_bounds[0]
    d2 = jnp.sum((f[:, None, :] - f[None, :, :]) ** 2, axis=-1)
    covar = outputscale * jnp.exp(-0.5 * d2 / (lengthscale * lengthscale))
    mean = jnp.full((x.shape[0],), mean_const, dtype=jnp.float32)
    return mean, covar


if __name__ == "__main__":
    D_IN, HID, FEAT = 32, 64, 8

    key = jax.random.PRNGKey(0)
    k_w1, k_b1, k_w2, k_b2, *k_xs = jax.random.split(key, 8)

    # Deterministic synthetic parameters (no checkpoint load).
    w1 = jax.random.normal(k_w1, (D_IN, HID), dtype=jnp.float32) * (1.0 / jnp.sqrt(D_IN))
    b1 = jax.random.normal(k_b1, (1, HID), dtype=jnp.float32) * 0.01
    w2 = jax.random.normal(k_w2, (HID, FEAT), dtype=jnp.float32) * (1.0 / jnp.sqrt(HID))
    b2 = jax.random.normal(k_b2, (1, FEAT), dtype=jnp.float32) * 0.01
    params = (w1, b1, w2, b2)
    hparams = dict(grid_bounds=(-1.0, 1.0), lengthscale=0.6931472,
                   outputscale=0.6931472, mean_const=0.0)

    # N=16     -> fused single-kernel path (small).
    # N=200    -> fused path with a non-multiple-of-128 batch.
    # N=640    -> tiled, lane-dense, two-TC-parallel covariance path (exact 128 multiple).
    # N=650    -> tiled path with feature padding + final slice.
    for n, k_x in zip((16, 200, 640, 650), k_xs):
        x = jax.random.normal(k_x, (n, D_IN), dtype=jnp.float32)
        mean, covar = dkl_forward(x, params, **hparams)
        jax.block_until_ready((mean, covar))

        mean_r, covar_r = _reference(x, params, **hparams)
        assert mean.shape == (n,) and covar.shape == (n, n)
        assert bool(jnp.all(jnp.isfinite(covar)))
        assert bool(jnp.allclose(mean, mean_r, atol=1e-6))
        assert bool(jnp.allclose(covar, covar_r, rtol=5e-3, atol=5e-3))

    # TODO(synk): the gpytorch regression model returns a MultivariateNormal distribution
    # object; the kernels return its defining (mean, covariance) tensors instead.
    print("KERNEL_OK")
</pallas_src>

<mosaic_0001>
module attributes {stable_mosaic.version = 11 : i64} {
  func.func @dkl_fused_kernel(%arg0: memref<16x32xf32, #tpu.memory_space<vmem>>, %arg1: memref<32x64xf32, #tpu.memory_space<vmem>>, %arg2: memref<1x64xf32, #tpu.memory_space<vmem>>, %arg3: memref<64x8xf32, #tpu.memory_space<vmem>>, %arg4: memref<1x8xf32, #tpu.memory_space<vmem>>, %arg5: memref<16x16xf32, #tpu.memory_space<vmem>>) attributes {dimension_semantics = [], scalar_prefetch = 0 : i64, scratch_operands = 0 : i64, tpu.core_type = #tpu.core_type<tc>} {
    %c0 = arith.constant 0 : index
    %c0_0 = arith.constant 0 : index
    %0 = vector.load %arg0[%c0, %c0_0] : memref<16x32xf32, #tpu.memory_space<vmem>>, vector<16x32xf32>
    %c0_1 = arith.constant 0 : index
    %c0_2 = arith.constant 0 : index
    %1 = vector.load %arg1[%c0_1, %c0_2] : memref<32x64xf32, #tpu.memory_space<vmem>>, vector<32x64xf32>
    %c0_3 = arith.constant 0 : index
    %c0_4 = arith.constant 0 : index
    %2 = vector.load %arg2[%c0_3, %c0_4] : memref<1x64xf32, #tpu.memory_space<vmem>>, vector<1x64xf32>
    %c0_5 = arith.constant 0 : index
    %c0_6 = arith.constant 0 : index
    %3 = vector.load %arg3[%c0_5, %c0_6] : memref<64x8xf32, #tpu.memory_space<vmem>>, vector<64x8xf32>
    %c0_7 = arith.constant 0 : index
    %c0_8 = arith.constant 0 : index
    %4 = vector.load %arg4[%c0_7, %c0_8] : memref<1x8xf32, #tpu.memory_space<vmem>>, vector<1x8xf32>
    %cst = arith.constant dense<0.000000e+00> : vector<16x64xf32>
    %5 = tpu.matmul %0, %1, %cst {dimension_numbers = #tpu.dot_dimension_numbers<[1], [0], [0], [1], [0, 0, 1, 1], [], []>} : vector<16x32xf32>, vector<32x64xf32>, vector<16x64xf32> -> vector<16x64xf32>
    %6 = vector.broadcast %2 : vector<1x64xf32> to vector<16x64xf32>
    %7 = arith.addf %5, %6 : vector<16x64xf32>
    %cst_9 = arith.constant 0.000000e+00 : f32
    %8 = vector.broadcast %cst_9 : f32 to vector<16x64xf32>
    %9 = arith.maximumf %7, %8 : vector<16x64xf32>
    %cst_10 = arith.constant dense<0.000000e+00> : vector<16x8xf32>
    %10 = tpu.matmul %9, %3, %cst_10 {dimension_numbers = #tpu.dot_dimension_numbers<[1], [0], [0], [1], [0, 0, 1, 1], [], []>} : vector<16x64xf32>, vector<64x8xf32>, vector<16x8xf32> -> vector<16x8xf32>
    %11 = vector.broadcast %4 : vector<1x8xf32> to vector<16x8xf32>
    %12 = arith.addf %10, %11 : vector<16x8xf32>
    %13 = vector.shape_cast %12 : vector<16x8xf32> to vector<1x16x8xf32>
    %cst_11 = arith.constant dense<0x7F800000> : vector<1xf32>
    %14 = vector.multi_reduction <minimumf>, %13, %cst_11 [1, 2] : vector<1x16x8xf32> to vector<1xf32>
    %15 = vector.shape_cast %14 : vector<1xf32> to vector<1x1x1xf32>
    %16 = vector.extract %15[0, 0, 0] : f32 from vector<1x1x1xf32>
    %17 = vector.shape_cast %12 : vector<16x8xf32> to vector<1x16x8xf32>
    %cst_12 = arith.constant dense<0xFF800000> : vector<1xf32>
    %18 = vector.multi_reduction <maximumf>, %17, %cst_12 [1, 2] : vector<1x16x8xf32> to vector<1xf32>
    %19 = vector.shape_cast %18 : vector<1xf32> to vector<1x1x1xf32>
    %20 = vector.extract %19[0, 0, 0] : f32 from vector<1x1x1xf32>
    %21 = arith.subf %20, %16 : f32
    %cst_13 = arith.constant 9.99999996E-13 : f32
    %22 = arith.maximumf %21, %cst_13 : f32
    %cst_14 = arith.constant 1.900000e+00 : f32
    %23 = arith.divf %cst_14, %22 : f32
    %24 = vector.broadcast %16 : f32 to vector<16x8xf32>
    %25 = arith.subf %12, %24 : vector<16x8xf32>
    %26 = vector.broadcast %23 : f32 to vector<16x8xf32>
    %27 = arith.mulf %25, %26 : vector<16x8xf32>
    %cst_15 = arith.constant -0.949999988 : f32
    %28 = vector.broadcast %cst_15 : f32 to vector<16x8xf32>
    %29 = arith.addf %27, %28 : vector<16x8xf32>
    %30 = arith.mulf %29, %29 : vector<16x8xf32>
    %cst_16 = arith.constant dense<0.000000e+00> : vector<16xf32>
    %31 = vector.multi_reduction <add>, %30, %cst_16 [1] : vector<16x8xf32> to vector<16xf32>
    %32 = vector.shape_cast %31 : vector<16xf32> to vector<16x1xf32>
    %33 = tpu.transpose %32, [1, 0] : vector<16x1xf32> -> vector<1x16xf32>
    %cst_17 = arith.constant dense<0.000000e+00> : vector<16x16xf32>
    %34 = tpu.matmul %29, %29, %cst_17 {dimension_numbers = #tpu.dot_dimension_numbers<[1], [1], [0], [0], [0, 0, 1, 0], [], []>} : vector<16x8xf32>, vector<16x8xf32>, vector<16x16xf32> -> vector<16x16xf32>
    %35 = vector.broadcast %32 : vector<16x1xf32> to vector<16x16xf32>
    %36 = vector.broadcast %33 : vector<1x16xf32> to vector<16x16xf32>
    %37 = arith.addf %35, %36 : vector<16x16xf32>
    %cst_18 = arith.constant 2.000000e+00 : f32
    %38 = vector.broadcast %cst_18 : f32 to vector<16x16xf32>
    %39 = arith.mulf %38, %34 : vector<16x16xf32>
    %40 = arith.subf %37, %39 : vector<16x16xf32>
    %cst_19 = arith.constant 0.000000e+00 : f32
    %41 = vector.broadcast %cst_19 : f32 to vector<16x16xf32>
    %42 = arith.maximumf %40, %41 : vector<16x16xf32>
    %cst_20 = arith.constant -1.04068446 : f32
    %43 = vector.broadcast %cst_20 : f32 to vector<16x16xf32>
    %44 = arith.mulf %42, %43 : vector<16x16xf32>
    %45 = math.exp %44 : vector<16x16xf32>
    %cst_21 = arith.constant 0.693147182 : f32
    %46 = vector.broadcast %cst_21 : f32 to vector<16x16xf32>
    %47 = arith.mulf %46, %45 : vector<16x16xf32>
    %c0_22 = arith.constant 0 : index
    %c0_23 = arith.constant 0 : index
    %48 = vector.load %arg5[%c0_22, %c0_23] : memref<16x16xf32, #tpu.memory_space<vmem>>, vector<16x16xf32>
    tpu.vector_store %arg5[%c0_22, %c0_23], %47 {strides = array<i32>} : memref<16x16xf32, #tpu.memory_space<vmem>>, vector<16x16xf32>,
    return
  }
}

</mosaic_0001>

<bundles_post_ra>
// kernel: tpu_custom_call.1
= control target key start
LH: loop header
LB: loop body
LE: loop exit
PB: predicated region body
PF: predicated region fallthrough
CT: control target
= control target key end

     0   :  { %vm43_vm0 = vcmask 261120   ;;  %s619_s0 = inlined_call_operand.vmem [shape: f32[16,32], index: 0, kind: input, shape index: {}]   ;;  %s620_s1 = inlined_call_operand.vmem [shape: f32[32,64], index: 1, kind: input, shape index: {}]   ;;  %s621_s2 = inlined_call_operand.vmem [shape: f32[1,64], index: 2, kind: input, shape index: {}]   ;;  %s622_s3 = inlined_call_operand.vmem [shape: f32[64,8], index: 3, kind: input, shape index: {}]   ;;  %s623_s4 = inlined_call_operand.vmem [shape: f32[1,8], index: 4, kind: input, shape index: {}]   ;;  %s624_s5 = inlined_call_operand.hbm [shape: f32[16,16], index: 5, kind: output, shape index: {}]  }
   0x1   :  { %v26_v0 = vld [vmem:[%s620_s1 + $0x18] sm:$0xff]  ;;  %v25_v1 = vld [vmem:[%s620_s1 + $0x10] sm:$0xff]  ;;  %v21_v2 = vld [vmem:[%s619_s0] sm:$0xff] }
   0x2   :  { %444 = vmatprep.subr.mxu0 %v26_v0  ;;  %v24_v3 = vld [vmem:[%s620_s1 + $0x8] sm:$0xff]  ;;  %452 = vmatprep.mubr.msk.f32.mxu0 %vm43_vm0, %v21_v2  ;;  %v35_v4 = vld [vmem:[%s622_s3 + $0x38] sm:$0xff]  ;;  %v34_v5 = vld [vmem:[%s622_s3 + $0x30] sm:$0xff] }
   0x3   :  { %445 = vmatpush3.msra.mxu0 %v26_v0  ;;  %455 = vmatprep.subr.mxu1 %v35_v4 }
   0x4   :  { %446 = vmatprep.subr.mxu0 %v25_v1 }
   0x5   :  { %10 = vsyncpa [#allocation3], 0  ;;  %447 = vmatpush3.msra.mxu0 %v25_v1  ;;  %v23_v6 = vld [vmem:[%s620_s1] sm:$0xff]  ;;  %456 = vmatpush3.msra.mxu1 %v35_v4  ;;  %v33_v7 = vld [vmem:[%s622_s3 + $0x28] sm:$0xff]  ;;  %vm133_vm1 = vcmask 523264   ;;  %vm215_vm2 = vcmask 64512   ;;  %v375_v62 = vlaneseq }
   0x6   :  { %448 = vmatprep.subr.mxu0 %v24_v3  ;;  %457 = vmatprep.subr.mxu1 %v34_v5  ;;  %v22_v8 = vld [vmem:[%s619_s0 + $0x8] sm:$0xff]  ;;  %v32_v9 = vld [vmem:[%s622_s3 + $0x20] sm:$0xff]  ;;  %v31_v10 = vld [vmem:[%s622_s3 + $0x18] sm:$0xff]  ;;  %s520_s23 = smov 1e-12   ;;  %s521_s27 = smov [#allocation2]  }
   0x7   :  { %449 = vmatpush3.msra.mxu0 %v24_v3  ;;  %458 = vmatpush3.msra.mxu1 %v34_v5  ;;  %v30_v11 = vld [vmem:[%s622_s3 + $0x10] sm:$0xff]  ;;  %v29_v12 = vld [vmem:[%s622_s3 + $0x8] sm:$0xff]  ;;  %v28_v13 = vld [vmem:[%s622_s3] sm:$0xff]  ;;  %v376_v63 = vshrl.u32 %v375_v62, 7  ;;  %s403_s28 = sshll.u32 %s521_s27, 4  ;;  %vm395_vm3 = vcmask 130048   ;;  %s404_s28 = int_to_ptr.vmem [resolvable:$true] %s403_s28 }
   0x8   :  { %450 = vmatprep.subr.mxu0 %v23_v6  ;;  %459 = vmatprep.subr.mxu1 %v33_v7  ;;  %v414_v14 = vld [vmem:[%s621_s2] ss:$0 sm:$0xff]  ;;  %s498_s29 = scalar_lea.vmem %s404_s28, 256  ;;  %p503_p1 = scmp.lt.s32.totalorder %s404_s28, %s404_s28 }
   0x9   :  { %451 = vmatpush3.msra.mxu0 %v23_v6  ;;  %460 = vmatpush3.msra.mxu1 %v33_v7  ;;  %v417_v21 = vld [vmem:[%s623_s4] ss:$0 sm:$0xff]  ;;  %v377_v1 = vsub.s32 0, %v376_v63  ;;  %p499_p0 = scmp.ne.s32.totalorder %s404_s28, %s498_s29  ;;  %p504_p2 = scmp.lt.s32.totalorder %s498_s29, %s498_s29 }
   0xa   :  { %453 = vmatmul.mubr.msk.f32.vlgmr.msra.gmra.mxu0 %vm43_vm0, %v22_v8  ;;  %461 = vmatprep.subr.mxu1 %v32_v9 }
   0xb   :  { %462 = vmatpush3.msra.mxu1 %v32_v9  ;;  %p505_p3 = por %p504_p2, %p503_p1 }
   0xc   :  { %463 = vmatprep.subr.mxu1 %v31_v10 }
   0xd   :  { %464 = vmatpush3.msra.mxu1 %v31_v10  ;;  %p506_p4 = pnand %p505_p3, %p499_p0 }
   0xe   :  { %465 = vmatprep.subr.mxu1 %v30_v11 }
   0xf   :  { %466 = vmatpush3.msra.mxu1 %v30_v11 }
  0x10   :  { %467 = vmatprep.subr.mxu1 %v29_v12 }
  0x11   :  { %468 = vmatpush3.msra.mxu1 %v29_v12 }
  0x12   :  { %469 = vmatprep.subr.mxu1 %v28_v13 }
  0x13   :  { %470 = vmatpush3.msra.mxu1 %v28_v13 }
  0xca   :  { %v454_v15 = vpop.f32.mrf.mxu0 }
  0xcb   :  { %v122_v16 = vadd.f32 %v454_v15, %v414_v14 }
  0xcc   :  { %v116_v17 = vpop.f32.mrf.mxu0 }
  0xcd   :  { %v117_v18 = vadd.f32 %v414_v14, %v116_v17  ;;  %v126_v20 = vmax.f32 %v122_v16, 0.0 }
  0xcf   :  { %v125_v19 = vmax.f32 %v117_v18, 0.0 }
  0xd1   :  { %471 = vmatprep.mubr.msk.f32.mxu1 %vm133_vm1, %v125_v19 }
  0xd2   :  { %472 = vmatmul.mubr.msk.f32.vlgmr.msra.gmra.mxu1 %vm133_vm1, %v126_v20 }
 0x192   :  { %v473_v22 = vpop.f32.mrf.mxu1 }
 0x193   :  { %v212_v23 = vadd.f32 %v473_v22, %v417_v21 }
 0x194   :  { %v206_v24 = vpop.f32.mrf.mxu1 }
 0x195   :  { %v207_v25 = vadd.f32 %v417_v21, %v206_v24  ;;  %v217_v27 = vsel %vm215_vm2, %v212_v23, inf  ;;  %v229_v30 = vsel %vm215_vm2, %v212_v23, -inf }
 0x197   :  { %v216_v26 = vsel %vm215_vm2, %v207_v25, inf  ;;  %v228_v29 = vsel %vm215_vm2, %v207_v25, -inf }
 0x198   :  { %v218_v28 = vmin.f32 %v216_v26, %v217_v27  ;;  %v230_v31 = vmax.f32 %v228_v29, %v229_v30 }
 0x19a   :  { %219 = vmin.xlane.f32.xlu0 %v218_v28 }
 0x19e   :  { %231 = vmax.xlane.f32.xlu0 %v230_v31 }
 0x223   :  { %v220_v32 = vpop.xlane.xlu0 %219 }
 0x224   :  { %v221_v33 = vrot.slane %v220_v32, 4 }
 0x226   :  { %v222_v34 = vmin.f32 %v220_v32, %v221_v33 }
 0x227   :  { %v232_v35 = vpop.xlane.xlu0 %231 }
 0x228   :  { %v223_v36 = vrot.slane %v222_v34, 2  ;;  %v233_v37 = vrot.slane %v232_v35, 4 }
 0x22a   :  { %v234_v38 = vmax.f32 %v232_v35, %v233_v37  ;;  %v224_v39 = vmin.f32 %v222_v34, %v223_v36 }
 0x22c   :  { %v235_v40 = vrot.slane %v234_v38, 2  ;;  %v225_v41 = vrot.slane %v224_v39, 1 }
 0x22e   :  { %v226_v42 = vmin.f32 %v224_v39, %v225_v41  ;;  %v236_v43 = vmax.f32 %v234_v38, %v235_v40 }
 0x230   :  { %481 = vpush %v226_v42  ;;  %v237_v44 = vrot.slane %v236_v43, 1 }
 0x232   :  { %v238_v45 = vmax.f32 %v236_v43, %v237_v44 }
 0x234   :  { %483 = vpush %v238_v45 }
 0x261   :  { %s482_s2 = spop %481 }
 0x262   :  { %v246_v48 = vstv %s482_s2 }
 0x263   :  { %v247_v49 = vsub.f32 %v207_v25, %v246_v48  ;;  %v248_v50 = vsub.f32 %v212_v23, %v246_v48 }
 0x265   :  { %s484_s3 = spop %483 }
 0x266   :  { %s240_s4 = ssub.f32 %s484_s3, %s482_s2 }
 0x268   :  { %s241_s24 = smax.f32 %s520_s23, %s240_s4 }
 0x269   :  { %v242_v46 = vstv %s241_s24 }
 0x26a   :  { %492 = vrcp.f32 %v242_v46 }
 0x277   :  { %v493_v47 = vpop.eup %492 }
 0x278   :  { %485 = vpush %v493_v47 }
 0x2a9   :  { %s486_s25 = spop %485 }
 0x2aa   :  { %s245_s26 = smul.f32 1.9, %s486_s25 }
 0x2ac   :  { %v249_v51 = vstv %s245_s26 }
 0x2ad   :  { %v250_v52 = vmul.f32 %v249_v51, %v247_v49  ;;  %v251_v53 = vmul.f32 %v249_v51, %v248_v50 }
 0x2af   :  { %v252_v54 = vadd.f32 -0.95, %v250_v52  ;;  %v253_v55 = vadd.f32 -0.95, %v251_v53 }
 0x2b1   :  { %474 = vmatprep.subr.msk.mxu0 %vm215_vm2, %v253_v55  ;;  %478 = vmatprep.mubr.msk.f32.mxu0 %vm215_vm2, %v252_v54  ;;  %v254_v56 = vmul.f32 %v252_v54, %v252_v54  ;;  %v255_v58 = vmul.f32 %v253_v55, %v253_v55 }
 0x2b2   :  { %475 = vmatpush3.xpose.msk.msra.mxu0 %vm215_vm2, %v253_v55 }
 0x2b3   :  { %476 = vmatprep.subr.msk.mxu0 %vm215_vm2, %v252_v54  ;;  %v256_v57 = vsel %vm215_vm2, %v254_v56, 0.0  ;;  %v259_v59 = vsel %vm215_vm2, %v255_v58, 0.0 }
 0x2b4   :  { %257 = vadd.xlane.f32.xlu1 %v256_v57 }
 0x2b6   :  { %477 = vmatpush3.xpose.msk.msra.mxu0 %vm215_vm2, %v252_v54 }
 0x2b8   :  { %260 = vadd.xlane.f32.xlu1 %v259_v59 }
 0x2b9   :  { %479 = vmatmul.mubr.msk.f32.vlgmr.msra.gmra.mxu0 %vm215_vm2, %v253_v55 }
 0x33d   :  { %v258_v60 = vpop.xlane.xlu1 %257 }
 0x33e   :  { %262 = vxpose.xlu0.b32.start [1/2] (short) (narrow) %v258_v60, 8 }
 0x341   :  { %v261_v61 = vpop.xlane.xlu1 %260 }
 0x342   :  { %263 = vxpose.xlu0.b32.end [2/2] (short) (narrow) %v261_v61, 8 }
 0x379   :  { %v480_v0 = vpop.f32.mrf.mxu0 }
 0x37a   :  { %v382_v5 = vmul.f32 2.0, %v480_v0 }
 0x37b   :  { %v366_v2 = vpop.f32.mrf.mxu0 }
 0x37c   :  { %v381_v6 = vmul.f32 2.0, %v366_v2 }
 0x3ba   :  { %v278_v3 = vpop.trf.xlu0 }
 0x3bb   :  { %v378_v4 = vrot.slane %v278_v3, %v377_v1 }
 0x3bd   :  { %v379_v7 = vadd.f32 %v378_v4, %v258_v60  ;;  %v380_v8 = vadd.f32 %v378_v4, %v261_v61 }
 0x3bf   :  { %v383_v9 = vsub.f32 %v379_v7, %v381_v6  ;;  %v384_v10 = vsub.f32 %v380_v8, %v382_v5 }
 0x3c1   :  { %v385_v11 = vmax.f32 %v383_v9, 0.0  ;;  %v386_v12 = vmax.f32 %v384_v10, 0.0 }
 0x3c3   :  { %v387_v13 = vmul.f32 -1.0406845, %v385_v11  ;;  %v388_v14 = vmul.f32 -1.0406845, %v386_v12 }
 0x3c5   :  { %v389_v15 = vmul.f32 1.442695, %v387_v13  ;;  %v391_v16 = vmul.f32 1.442695, %v388_v14 }
 0x3c7   :  { %494 = vpow2.f32 %v389_v15 }
 0x3c8   :  { %496 = vpow2.f32 %v391_v16 }
 0x3d4   :  { %v495_v17 = vpop.eup %494 }
 0x3d5   :  { %v497_v18 = vpop.eup %496  ;;  %v393_v19 = vmul.f32 0.6931472, %v495_v17 }
 0x3d6   :  { %v394_v20 = vmul.f32 0.6931472, %v497_v18 }
 0x3d7   :  { %396 = vst.msk [vmem:[#allocation2] sm:$0xff] %vm395_vm3, %v393_v19 }
 0x3d8   :  { %397 = vst.msk [vmem:[#allocation2 + $0x8] sm:$0xff] %vm395_vm3, %v394_v20 }
 0x3d9   :  { %509 = shalt.err (!%p506_p4)
}
 0x3da   :  { %s522_s30 = smov 128   ;;  %s523_s6 = smov 8  }
 0x3db   :  { %409 = dma.vmem_to_hbm [thread:$0]  %s404_s28, 256, %s624_s5, [#allocation3], %s522_s30, %s522_s30, %s523_s6  }
 0x3dc   :  { %518 = dma.done.wait [#allocation3], 256  }
 0x3dd   :  { %519 = vsyncadd [#allocation3], 4294967040 }
 0x3de   :  { %413 = vsyncpa [#allocation3], 1 }

</bundles_post_ra>
